<compile_context>
chip_gen: v6e
topology: v6e:2x2x1
jax: 0.10.0
libtpu: 0.0.40
codegen_flags: <defaults>
</compile_context>

<pallas_src>
import jax
import jax.numpy as jnp
from jax.experimental import pallas as pl
from jax.experimental.pallas import tpu as pltpu  # noqa: F401  (TPU backend)

# ---- small synthetic sizes (consistent with the forward semantics) ----
B = 4             # batch
S = 8             # sequence length
H = 32            # hidden size ("bert.config.hidden_size")
F = 64            # FFN intermediate size
NUM_LABELS_A = 1  # reg_head outputs
NUM_LABELS_B = 3  # cls_head outputs
NUM_HEAD_OUT = NUM_LABELS_A + NUM_LABELS_B   # fused head width = 4
HEAD_PAD = 128                               # lane-dense padded head width
VOCAB = 64

# rows of the packed misc slab (f32, (16, 128))
ROW_BQKV, ROW_BO, ROW_LN1G, ROW_LN1B = 0, 1, 2, 3
ROW_B1, ROW_B2, ROW_LN2G, ROW_LN2B, ROW_HEADB = 4, 5, 6, 7, 8
MISC_ROWS = 16


def _layernorm(x, g, b, eps=1e-7):
    mu = jnp.mean(x, axis=-1, keepdims=True)
    var = jnp.mean((x - mu) ** 2, axis=-1, keepdims=True)
    return (x - mu) * jax.lax.rsqrt(var + eps) * g + b


def encoder_heads_kernel(
    x_ref,        # (B, S, H)   f32 embeddings
    maskb_ref,    # (B, 1, S)   f32 additive attention-mask bias
    wqkv_ref,     # (H, 3H)     bf16 fused QKV weights (Q slice pre-scaled)
    wo_ref,       # (H, H)      bf16 attention output proj
    w1_ref,       # (H, F)      bf16 FFN up
    w2_ref,       # (F, H)      bf16 FFN down
    headw_ref,    # (H, 128)    bf16 fused reg+cls head, zero-padded lanes
    misc_ref,     # (16, 128)   f32 packed biases / LN params / head bias
    out_ref,      # (B, 128)    f32 lane-dense output
):
    x3 = x_ref[...]                              # (B, S, H) f32
    mask_bias = maskb_ref[...]                   # (B, 1, S) f32
    misc = misc_ref[...]                         # (16, 128) f32

    bqkv = misc[ROW_BQKV, : 3 * H]
    bo = misc[ROW_BO, :H]
    ln1g = misc[ROW_LN1G, :H]
    ln1b = misc[ROW_LN1B, :H]
    b1 = misc[ROW_B1, :F]
    b2 = misc[ROW_B2, :H]
    ln2g = misc[ROW_LN2G, :H]
    ln2b = misc[ROW_LN2B, :H]
    headb = misc[ROW_HEADB, :]                   # (128,)

    xr = x3.reshape(B * S, H)                    # f32 residual stream

    # --- fused QKV projection (one MXU push, bf16 operands, f32 accumulation)
    qkv = jnp.dot(xr.astype(jnp.bfloat16), wqkv_ref[...],
                  preferred_element_type=jnp.float32) + bqkv
    q = qkv[:, 0 * H:1 * H].reshape(B, S, H)     # 1/sqrt(H) already folded in
    k = qkv[:, 1 * H:2 * H].reshape(B, S, H)
    v = qkv[:, 2 * H:3 * H].reshape(B, S, H)

    # --- batched single-head self-attention (transpose-free MXU path)
    scores = jnp.einsum("bqd,bkd->bqk",
                        q.astype(jnp.bfloat16), k.astype(jnp.bfloat16),
                        preferred_element_type=jnp.float32)
    scores = scores + mask_bias                  # additive padding mask (f32)
    scores = scores - jnp.max(scores, axis=-1, keepdims=True)
    p = jnp.exp(scores)
    denom = jnp.sum(p, axis=-1, keepdims=True)
    # EUP reciprocal; switch to approx=False for tighter softmax parity.
    p = p * pl.reciprocal(denom, approx=True)

    attn = jnp.einsum("bqk,bkd->bqd",
                      p.astype(jnp.bfloat16), v.astype(jnp.bfloat16),
                      preferred_element_type=jnp.float32)
    attn = attn.reshape(B * S, H)
    attn = jnp.dot(attn.astype(jnp.bfloat16), wo_ref[...],
                   preferred_element_type=jnp.float32) + bo
    h1 = _layernorm(xr + attn, ln1g, ln1b)       # (B*S, H) f32

    # --- CLS-only tail: only row 0 of each sequence feeds the heads, so the
    #     FFN / LN2 / head matmuls run on a (B, H) slab (final-layer only).
    cls = h1.reshape(B, S, H)[:, 0, :]           # (B, H) f32

    ff = jnp.dot(cls.astype(jnp.bfloat16), w1_ref[...],
                 preferred_element_type=jnp.float32) + b1
    # TODO(synk): HF DeBERTa uses exact erf-GELU; tanh approximation used here.
    ff = jax.nn.gelu(ff, approximate=True)
    ff = jnp.dot(ff.astype(jnp.bfloat16), w2_ref[...],
                 preferred_element_type=jnp.float32) + b2
    h2 = _layernorm(cls + ff, ln2g, ln2b)        # (B, H) f32

    # --- fused reg+cls heads: one (H, 128) matmul, lane-dense unmasked store.
    #     dropout(p=0.1) on the pooled vector is identity at inference.
    out = jnp.dot(h2.astype(jnp.bfloat16), headw_ref[...],
                  preferred_element_type=jnp.float32) + headb
    out_ref[...] = out                           # (B, 128)


def _pack_row(vec, width=HEAD_PAD):
    vec = vec.reshape(-1).astype(jnp.float32)
    return jnp.pad(vec, (0, width - vec.shape[0]))


def prepare_params(params):
    """One-time weight prep: transpose to [in,out], fuse, scale-fold, bf16-cast,
    and pack all tiny vectors into a single (16, 128) f32 misc slab."""
    scale = H ** -0.5
    wqkv = jnp.concatenate(
        [params["wq"].T * scale, params["wk"].T, params["wv"].T], axis=1)      # (H, 3H)
    bqkv = jnp.concatenate(
        [params["bq"] * scale, params["bk"], params["bv"]], axis=1)            # (1, 3H)

    head_w = jnp.concatenate([params["reg_w"].T, params["cls_w"].T], axis=1)   # (H, 4)
    head_w = jnp.pad(head_w, ((0, 0), (0, HEAD_PAD - NUM_HEAD_OUT)))           # (H, 128)
    head_b = jnp.concatenate([params["reg_b"], params["cls_b"]], axis=1)       # (1, 4)

    misc = jnp.zeros((MISC_ROWS, HEAD_PAD), jnp.float32)
    rows = jnp.stack([
        _pack_row(bqkv), _pack_row(params["bo"]),
        _pack_row(params["ln1_g"]), _pack_row(params["ln1_b"]),
        _pack_row(params["b1"]), _pack_row(params["b2"]),
        _pack_row(params["ln2_g"]), _pack_row(params["ln2_b"]),
        _pack_row(head_b),
    ])
    misc = misc.at[: rows.shape[0]].set(rows)

    return {
        "tok_emb": params["tok_emb"].astype(jnp.float32),
        "pos_emb": params["pos_emb"].astype(jnp.float32),
        "wqkv": wqkv.astype(jnp.bfloat16),
        "wo": params["wo"].T.astype(jnp.bfloat16),
        "w1": params["w1"].T.astype(jnp.bfloat16),
        "w2": params["w2"].T.astype(jnp.bfloat16),
        "head_w": head_w.astype(jnp.bfloat16),
        "misc": misc,
    }


def multi_label_forward(prep, input_ids, attention_mask):
    # --- embedding lookup (glue; the hot path lives in the Pallas kernel) ---
    # TODO(synk): at real sizes this gather could be fused into the kernel via
    # PrefetchScalarGridSpec row-gather; negligible at B=4, S=8.
    x = prep["tok_emb"][input_ids] + prep["pos_emb"][None, :, :]    # (B, S, H) f32
    x = x.astype(jnp.float32)
    # additive mask bias: 0 where attended, -1e9 where padded (kept in f32)
    mask_bias = (attention_mask.astype(jnp.float32) - 1.0).reshape(B, 1, S) * 1e9

    # Single kernel invocation (no grid): all operands are full-array VMEM
    # blocks; at real DeBERTa sizes this would become a K/N-tiled grid with an
    # "arbitrary" reduction axis + f32 accumulator scratch (v7x VMEM limits).
    out = pl.pallas_call(
        encoder_heads_kernel,
        out_shape=jax.ShapeDtypeStruct((B, HEAD_PAD), jnp.float32),
    )(
        x, mask_bias,
        prep["wqkv"], prep["wo"], prep["w1"], prep["w2"],
        prep["head_w"], prep["misc"],
    )

    score_pred = out[:, 0]                                   # reg_head(...).squeeze(-1)
    class_logits = out[:, NUM_LABELS_A:NUM_HEAD_OUT]         # (B, 3)
    return score_pred, class_logits


def init_params(key):
    ks = jax.random.split(key, 16)

    def w(k, shape, scale=0.02):
        return (scale * jax.random.normal(k, shape)).astype(jnp.float32)

    return {
        # TODO(synk): pretrained DeBERTa-large weights are not loadable here;
        # backbone is a deterministic synthetic 1-layer encoder of the same form.
        "tok_emb": w(ks[0], (VOCAB, H)),
        "pos_emb": w(ks[1], (S, H)),
        "wq": w(ks[2], (H, H)), "bq": jnp.zeros((1, H), jnp.float32),
        "wk": w(ks[3], (H, H)), "bk": jnp.zeros((1, H), jnp.float32),
        "wv": w(ks[4], (H, H)), "bv": jnp.zeros((1, H), jnp.float32),
        "wo": w(ks[5], (H, H)), "bo": jnp.zeros((1, H), jnp.float32),
        "ln1_g": jnp.ones((1, H), jnp.float32), "ln1_b": jnp.zeros((1, H), jnp.float32),
        "w1": w(ks[6], (F, H)), "b1": jnp.zeros((1, F), jnp.float32),
        "w2": w(ks[7], (H, F)), "b2": jnp.zeros((1, H), jnp.float32),
        "ln2_g": jnp.ones((1, H), jnp.float32), "ln2_b": jnp.zeros((1, H), jnp.float32),
        "reg_w": w(ks[8], (NUM_LABELS_A, H)),
        "reg_b": jnp.zeros((1, NUM_LABELS_A), jnp.float32),
        "cls_w": w(ks[9], (NUM_LABELS_B, H)),
        "cls_b": jnp.zeros((1, NUM_LABELS_B), jnp.float32),
    }


if __name__ == "__main__":
    key = jax.random.PRNGKey(0)
    k_param, k_ids = jax.random.split(key)

    params = init_params(k_param)
    prep = prepare_params(params)           # one-time weight prep (outside jit)

    input_ids = jax.random.randint(k_ids, (B, S), 0, VOCAB, dtype=jnp.int32)
    attention_mask = jnp.array(
        [
            [1] * S,
            [1] * (S - 2) + [0] * 2,
            [1] * (S - 4) + [0] * 4,
            [1] * S,
        ],
        dtype=jnp.int32,
    )

    score_pred, class_logits = jax.jit(multi_label_forward)(
        prep, input_ids, attention_mask
    )
    jax.block_until_ready((score_pred, class_logits))

    assert score_pred.shape == (B,)
    assert class_logits.shape == (B, NUM_LABELS_B)
    assert bool(jnp.all(jnp.isfinite(score_pred)))
    assert bool(jnp.all(jnp.isfinite(class_logits)))
    print("KERNEL_OK")
</pallas_src>

<mosaic_0001>
module attributes {stable_mosaic.version = 11 : i64} {
  func.func @encoder_heads_kernel(%arg0: memref<4x8x32xf32, #tpu.memory_space<vmem>>, %arg1: memref<4x1x8xf32, #tpu.memory_space<vmem>>, %arg2: memref<32x96xbf16, #tpu.memory_space<vmem>>, %arg3: memref<32x32xbf16, #tpu.memory_space<vmem>>, %arg4: memref<32x64xbf16, #tpu.memory_space<vmem>>, %arg5: memref<64x32xbf16, #tpu.memory_space<vmem>>, %arg6: memref<32x128xbf16, #tpu.memory_space<vmem>>, %arg7: memref<16x128xf32, #tpu.memory_space<vmem>>, %arg8: memref<4x128xf32, #tpu.memory_space<vmem>>) attributes {dimension_semantics = [], scalar_prefetch = 0 : i64, scratch_operands = 0 : i64, tpu.core_type = #tpu.core_type<tc>} {
    %c0 = arith.constant 0 : index
    %c0_0 = arith.constant 0 : index
    %c0_1 = arith.constant 0 : index
    %0 = vector.load %arg0[%c0, %c0_0, %c0_1] : memref<4x8x32xf32, #tpu.memory_space<vmem>>, vector<4x8x32xf32>
    %c0_2 = arith.constant 0 : index
    %c0_3 = arith.constant 0 : index
    %c0_4 = arith.constant 0 : index
    %1 = vector.load %arg1[%c0_2, %c0_3, %c0_4] : memref<4x1x8xf32, #tpu.memory_space<vmem>>, vector<4x1x8xf32>
    %c0_5 = arith.constant 0 : index
    %c0_6 = arith.constant 0 : index
    %2 = vector.load %arg7[%c0_5, %c0_6] : memref<16x128xf32, #tpu.memory_space<vmem>>, vector<16x128xf32>
    %3 = vector.extract_strided_slice %2 {offsets = [0, 0], sizes = [1, 96], strides = [1, 1]} : vector<16x128xf32> to vector<1x96xf32>
    %4 = vector.shape_cast %3 : vector<1x96xf32> to vector<96xf32>
    %5 = vector.extract_strided_slice %2 {offsets = [1, 0], sizes = [1, 32], strides = [1, 1]} : vector<16x128xf32> to vector<1x32xf32>
    %6 = vector.shape_cast %5 : vector<1x32xf32> to vector<32xf32>
    %7 = vector.extract_strided_slice %2 {offsets = [2, 0], sizes = [1, 32], strides = [1, 1]} : vector<16x128xf32> to vector<1x32xf32>
    %8 = vector.shape_cast %7 : vector<1x32xf32> to vector<32xf32>
    %9 = vector.extract_strided_slice %2 {offsets = [3, 0], sizes = [1, 32], strides = [1, 1]} : vector<16x128xf32> to vector<1x32xf32>
    %10 = vector.shape_cast %9 : vector<1x32xf32> to vector<32xf32>
    %11 = vector.extract_strided_slice %2 {offsets = [4, 0], sizes = [1, 64], strides = [1, 1]} : vector<16x128xf32> to vector<1x64xf32>
    %12 = vector.shape_cast %11 : vector<1x64xf32> to vector<64xf32>
    %13 = vector.extract_strided_slice %2 {offsets = [5, 0], sizes = [1, 32], strides = [1, 1]} : vector<16x128xf32> to vector<1x32xf32>
    %14 = vector.shape_cast %13 : vector<1x32xf32> to vector<32xf32>
    %15 = vector.extract_strided_slice %2 {offsets = [6, 0], sizes = [1, 32], strides = [1, 1]} : vector<16x128xf32> to vector<1x32xf32>
    %16 = vector.shape_cast %15 : vector<1x32xf32> to vector<32xf32>
    %17 = vector.extract_strided_slice %2 {offsets = [7, 0], sizes = [1, 32], strides = [1, 1]} : vector<16x128xf32> to vector<1x32xf32>
    %18 = vector.shape_cast %17 : vector<1x32xf32> to vector<32xf32>
    %19 = vector.extract_strided_slice %2 {offsets = [8, 0], sizes = [1, 128], strides = [1, 1]} : vector<16x128xf32> to vector<1x128xf32>
    %20 = vector.shape_cast %19 : vector<1x128xf32> to vector<128xf32>
    %21 = vector.shape_cast %0 : vector<4x8x32xf32> to vector<32x32xf32>
    %22 = arith.truncf %21 : vector<32x32xf32> to vector<32x32xbf16>
    %c0_7 = arith.constant 0 : index
    %c0_8 = arith.constant 0 : index
    %23 = vector.load %arg2[%c0_7, %c0_8] : memref<32x96xbf16, #tpu.memory_space<vmem>>, vector<32x96xbf16>
    %cst = arith.constant dense<0.000000e+00> : vector<32x96xf32>
    %24 = tpu.matmul %22, %23, %cst {dimension_numbers = #tpu.dot_dimension_numbers<[1], [0], [0], [1], [0, 0, 1, 1], [], []>} : vector<32x32xbf16>, vector<32x96xbf16>, vector<32x96xf32> -> vector<32x96xf32>
    %25 = vector.shape_cast %4 : vector<96xf32> to vector<1x96xf32>
    %26 = vector.broadcast %25 : vector<1x96xf32> to vector<32x96xf32>
    %27 = arith.addf %24, %26 : vector<32x96xf32>
    %28 = vector.extract_strided_slice %27 {offsets = [0, 0], sizes = [32, 32], strides = [1, 1]} : vector<32x96xf32> to vector<32x32xf32>
    %29 = vector.shape_cast %28 : vector<32x32xf32> to vector<4x8x32xf32>
    %30 = vector.extract_strided_slice %27 {offsets = [0, 32], sizes = [32, 32], strides = [1, 1]} : vector<32x96xf32> to vector<32x32xf32>
    %31 = vector.shape_cast %30 : vector<32x32xf32> to vector<4x8x32xf32>
    %32 = vector.extract_strided_slice %27 {offsets = [0, 64], sizes = [32, 32], strides = [1, 1]} : vector<32x96xf32> to vector<32x32xf32>
    %33 = vector.shape_cast %32 : vector<32x32xf32> to vector<4x8x32xf32>
    %34 = arith.truncf %29 : vector<4x8x32xf32> to vector<4x8x32xbf16>
    %35 = arith.truncf %31 : vector<4x8x32xf32> to vector<4x8x32xbf16>
    "tpu.trace_start"() <{level = 10 : i32, message = "bqd,bkd->bqk"}> : () -> ()
    %cst_9 = arith.constant dense<0.000000e+00> : vector<4x8x8xf32>
    %36 = tpu.matmul %34, %35, %cst_9 {dimension_numbers = #tpu.dot_dimension_numbers<[2], [2], [1], [1], [0, 0, 0, 1, 1, 1], [0], [0]>} : vector<4x8x32xbf16>, vector<4x8x32xbf16>, vector<4x8x8xf32> -> vector<4x8x8xf32>
    "tpu.trace_stop"() : () -> ()
    %37 = vector.broadcast %1 : vector<4x1x8xf32> to vector<4x8x8xf32>
    %38 = arith.addf %36, %37 : vector<4x8x8xf32>
    %cst_10 = arith.constant dense<0xFF800000> : vector<4x8xf32>
    %39 = vector.multi_reduction <maximumf>, %38, %cst_10 [2] : vector<4x8x8xf32> to vector<4x8xf32>
    %40 = vector.shape_cast %39 : vector<4x8xf32> to vector<4x8x1xf32>
    %41 = vector.broadcast %40 : vector<4x8x1xf32> to vector<4x8x8xf32>
    %42 = arith.subf %38, %41 : vector<4x8x8xf32>
    %43 = math.exp %42 : vector<4x8x8xf32>
    %cst_11 = arith.constant dense<0.000000e+00> : vector<4x8xf32>
    %44 = vector.multi_reduction <add>, %43, %cst_11 [2] : vector<4x8x8xf32> to vector<4x8xf32>
    %45 = vector.shape_cast %44 : vector<4x8xf32> to vector<4x8x1xf32>
    %46 = tpu.reciprocal %45 {approx = true} : vector<4x8x1xf32> -> vector<4x8x1xf32>
    %47 = vector.broadcast %46 : vector<4x8x1xf32> to vector<4x8x8xf32>
    %48 = arith.mulf %43, %47 : vector<4x8x8xf32>
    %49 = arith.truncf %48 : vector<4x8x8xf32> to vector<4x8x8xbf16>
    %50 = arith.truncf %33 : vector<4x8x32xf32> to vector<4x8x32xbf16>
    "tpu.trace_start"() <{level = 10 : i32, message = "bqk,bkd->bqd"}> : () -> ()
    %cst_12 = arith.constant dense<0.000000e+00> : vector<4x8x32xf32>
    %51 = tpu.matmul %49, %50, %cst_12 {dimension_numbers = #tpu.dot_dimension_numbers<[2], [1], [1], [2], [0, 0, 0, 1, 1, 2], [0], [0]>} : vector<4x8x8xbf16>, vector<4x8x32xbf16>, vector<4x8x32xf32> -> vector<4x8x32xf32>
    "tpu.trace_stop"() : () -> ()
    %52 = vector.shape_cast %51 : vector<4x8x32xf32> to vector<32x32xf32>
    %53 = arith.truncf %52 : vector<32x32xf32> to vector<32x32xbf16>
    %c0_13 = arith.constant 0 : index
    %c0_14 = arith.constant 0 : index
    %54 = vector.load %arg3[%c0_13, %c0_14] : memref<32x32xbf16, #tpu.memory_space<vmem>>, vector<32x32xbf16>
    %cst_15 = arith.constant dense<0.000000e+00> : vector<32x32xf32>
    %55 = tpu.matmul %53, %54, %cst_15 {dimension_numbers = #tpu.dot_dimension_numbers<[1], [0], [0], [1], [0, 0, 1, 1], [], []>} : vector<32x32xbf16>, vector<32x32xbf16>, vector<32x32xf32> -> vector<32x32xf32>
    %56 = vector.shape_cast %6 : vector<32xf32> to vector<1x32xf32>
    %57 = vector.broadcast %56 : vector<1x32xf32> to vector<32x32xf32>
    %58 = arith.addf %55, %57 : vector<32x32xf32>
    %59 = arith.addf %21, %58 : vector<32x32xf32>
    %cst_16 = arith.constant dense<0.000000e+00> : vector<32xf32>
    %60 = vector.multi_reduction <add>, %59, %cst_16 [1] : vector<32x32xf32> to vector<32xf32>
    %61 = vector.shape_cast %60 : vector<32xf32> to vector<32x1xf32>
    %cst_17 = arith.constant 3.200000e+01 : f32
    %62 = vector.broadcast %cst_17 : f32 to vector<32x1xf32>
    %63 = arith.divf %61, %62 : vector<32x1xf32>
    %64 = vector.broadcast %63 : vector<32x1xf32> to vector<32x32xf32>
    %65 = arith.subf %59, %64 : vector<32x32xf32>
    %66 = arith.mulf %65, %65 : vector<32x32xf32>
    %cst_18 = arith.constant dense<0.000000e+00> : vector<32xf32>
    %67 = vector.multi_reduction <add>, %66, %cst_18 [1] : vector<32x32xf32> to vector<32xf32>
    %68 = vector.shape_cast %67 : vector<32xf32> to vector<32x1xf32>
    %cst_19 = arith.constant 3.200000e+01 : f32
    %69 = vector.broadcast %cst_19 : f32 to vector<32x1xf32>
    %70 = arith.divf %68, %69 : vector<32x1xf32>
    %71 = vector.broadcast %63 : vector<32x1xf32> to vector<32x32xf32>
    %72 = arith.subf %59, %71 : vector<32x32xf32>
    %cst_20 = arith.constant 1.000000e-07 : f32
    %73 = vector.broadcast %cst_20 : f32 to vector<32x1xf32>
    %74 = arith.addf %70, %73 : vector<32x1xf32>
    %75 = math.rsqrt %74 : vector<32x1xf32>
    %76 = vector.broadcast %75 : vector<32x1xf32> to vector<32x32xf32>
    %77 = arith.mulf %72, %76 : vector<32x32xf32>
    %78 = vector.shape_cast %8 : vector<32xf32> to vector<1x32xf32>
    %79 = vector.broadcast %78 : vector<1x32xf32> to vector<32x32xf32>
    %80 = arith.mulf %77, %79 : vector<32x32xf32>
    %81 = vector.shape_cast %10 : vector<32xf32> to vector<1x32xf32>
    %82 = vector.broadcast %81 : vector<1x32xf32> to vector<32x32xf32>
    %83 = arith.addf %80, %82 : vector<32x32xf32>
    %84 = vector.shape_cast %83 : vector<32x32xf32> to vector<4x8x32xf32>
    %85 = vector.extract_strided_slice %84 {offsets = [0, 0, 0], sizes = [4, 1, 32], strides = [1, 1, 1]} : vector<4x8x32xf32> to vector<4x1x32xf32>
    %86 = vector.shape_cast %85 : vector<4x1x32xf32> to vector<4x32xf32>
    %87 = arith.truncf %86 : vector<4x32xf32> to vector<4x32xbf16>
    %c0_21 = arith.constant 0 : index
    %c0_22 = arith.constant 0 : index
    %88 = vector.load %arg4[%c0_21, %c0_22] : memref<32x64xbf16, #tpu.memory_space<vmem>>, vector<32x64xbf16>
    %cst_23 = arith.constant dense<0.000000e+00> : vector<4x64xf32>
    %89 = tpu.matmul %87, %88, %cst_23 {dimension_numbers = #tpu.dot_dimension_numbers<[1], [0], [0], [1], [0, 0, 1, 1], [], []>} : vector<4x32xbf16>, vector<32x64xbf16>, vector<4x64xf32> -> vector<4x64xf32>
    %90 = vector.shape_cast %12 : vector<64xf32> to vector<1x64xf32>
    %91 = vector.broadcast %90 : vector<1x64xf32> to vector<4x64xf32>
    %92 = arith.addf %89, %91 : vector<4x64xf32>
    %93 = arith.mulf %92, %92 : vector<4x64xf32>
    %94 = arith.mulf %92, %93 : vector<4x64xf32>
    %cst_24 = arith.constant 4.471500e-02 : f32
    %95 = vector.broadcast %cst_24 : f32 to vector<4x64xf32>
    %96 = arith.mulf %95, %94 : vector<4x64xf32>
    %97 = arith.addf %92, %96 : vector<4x64xf32>
    %cst_25 = arith.constant 0.797884583 : f32
    %98 = vector.broadcast %cst_25 : f32 to vector<4x64xf32>
    %99 = arith.mulf %98, %97 : vector<4x64xf32>
    %100 = math.tanh %99 : vector<4x64xf32>
    %cst_26 = arith.constant 1.000000e+00 : f32
    %101 = vector.broadcast %cst_26 : f32 to vector<4x64xf32>
    %102 = arith.addf %101, %100 : vector<4x64xf32>
    %cst_27 = arith.constant 5.000000e-01 : f32
    %103 = vector.broadcast %cst_27 : f32 to vector<4x64xf32>
    %104 = arith.mulf %103, %102 : vector<4x64xf32>
    %105 = arith.mulf %92, %104 : vector<4x64xf32>
    %106 = arith.truncf %105 : vector<4x64xf32> to vector<4x64xbf16>
    %c0_28 = arith.constant 0 : index
    %c0_29 = arith.constant 0 : index
    %107 = vector.load %arg5[%c0_28, %c0_29] : memref<64x32xbf16, #tpu.memory_space<vmem>>, vector<64x32xbf16>
    %cst_30 = arith.constant dense<0.000000e+00> : vector<4x32xf32>
    %108 = tpu.matmul %106, %107, %cst_30 {dimension_numbers = #tpu.dot_dimension_numbers<[1], [0], [0], [1], [0, 0, 1, 1], [], []>} : vector<4x64xbf16>, vector<64x32xbf16>, vector<4x32xf32> -> vector<4x32xf32>
    %109 = vector.shape_cast %14 : vector<32xf32> to vector<1x32xf32>
    %110 = vector.broadcast %109 : vector<1x32xf32> to vector<4x32xf32>
    %111 = arith.addf %108, %110 : vector<4x32xf32>
    %112 = arith.addf %86, %111 : vector<4x32xf32>
    %cst_31 = arith.constant dense<0.000000e+00> : vector<4xf32>
    %113 = vector.multi_reduction <add>, %112, %cst_31 [1] : vector<4x32xf32> to vector<4xf32>
    %114 = vector.shape_cast %113 : vector<4xf32> to vector<4x1xf32>
    %cst_32 = arith.constant 3.200000e+01 : f32
    %115 = vector.broadcast %cst_32 : f32 to vector<4x1xf32>
    %116 = arith.divf %114, %115 : vector<4x1xf32>
    %117 = vector.broadcast %116 : vector<4x1xf32> to vector<4x32xf32>
    %118 = arith.subf %112, %117 : vector<4x32xf32>
    %119 = arith.mulf %118, %118 : vector<4x32xf32>
    %cst_33 = arith.constant dense<0.000000e+00> : vector<4xf32>
    %120 = vector.multi_reduction <add>, %119, %cst_33 [1] : vector<4x32xf32> to vector<4xf32>
    %121 = vector.shape_cast %120 : vector<4xf32> to vector<4x1xf32>
    %cst_34 = arith.constant 3.200000e+01 : f32
    %122 = vector.broadcast %cst_34 : f32 to vector<4x1xf32>
    %123 = arith.divf %121, %122 : vector<4x1xf32>
    %124 = vector.broadcast %116 : vector<4x1xf32> to vector<4x32xf32>
    %125 = arith.subf %112, %124 : vector<4x32xf32>
    %cst_35 = arith.constant 1.000000e-07 : f32
    %126 = vector.broadcast %cst_35 : f32 to vector<4x1xf32>
    %127 = arith.addf %123, %126 : vector<4x1xf32>
    %128 = math.rsqrt %127 : vector<4x1xf32>
    %129 = vector.broadcast %128 : vector<4x1xf32> to vector<4x32xf32>
    %130 = arith.mulf %125, %129 : vector<4x32xf32>
    %131 = vector.shape_cast %16 : vector<32xf32> to vector<1x32xf32>
    %132 = vector.broadcast %131 : vector<1x32xf32> to vector<4x32xf32>
    %133 = arith.mulf %130, %132 : vector<4x32xf32>
    %134 = vector.shape_cast %18 : vector<32xf32> to vector<1x32xf32>
    %135 = vector.broadcast %134 : vector<1x32xf32> to vector<4x32xf32>
    %136 = arith.addf %133, %135 : vector<4x32xf32>
    %137 = arith.truncf %136 : vector<4x32xf32> to vector<4x32xbf16>
    %c0_36 = arith.constant 0 : index
    %c0_37 = arith.constant 0 : index
    %138 = vector.load %arg6[%c0_36, %c0_37] : memref<32x128xbf16, #tpu.memory_space<vmem>>, vector<32x128xbf16>
    %cst_38 = arith.constant dense<0.000000e+00> : vector<4x128xf32>
    %139 = tpu.matmul %137, %138, %cst_38 {dimension_numbers = #tpu.dot_dimension_numbers<[1], [0], [0], [1], [0, 0, 1, 1], [], []>} : vector<4x32xbf16>, vector<32x128xbf16>, vector<4x128xf32> -> vector<4x128xf32>
    %140 = vector.shape_cast %20 : vector<128xf32> to vector<1x128xf32>
    %141 = vector.broadcast %140 : vector<1x128xf32> to vector<4x128xf32>
    %142 = arith.addf %139, %141 : vector<4x128xf32>
    %c0_39 = arith.constant 0 : index
    %c0_40 = arith.constant 0 : index
    %143 = vector.load %arg8[%c0_39, %c0_40] : memref<4x128xf32, #tpu.memory_space<vmem>>, vector<4x128xf32>
    tpu.vector_store %arg8[%c0_39, %c0_40], %142 {strides = array<i32>} : memref<4x128xf32, #tpu.memory_space<vmem>>, vector<4x128xf32>,
    return
  }
}

</mosaic_0001>

<bundles_post_ra>
// kernel: multi_label_forward.1
= control target key start
LH: loop header
LB: loop body
LE: loop exit
PB: predicated region body
PF: predicated region fallthrough
CT: control target
= control target key end

     0   :  { %vm62_vm0 = vcmask 261120   ;;  %v46_v8 = vlaneseq  ;;  %v1287_v12 = vmov 0.0   ;;  %vm1288_vm1 = vmmov 0   ;;  %s1290_s26 = smov 64   ;;  %s1574_s2 = inlined_call_operand.vmem [shape: bf16[32,96], index: 2, kind: input, shape index: {}]   ;;  %s1575_s0 = inlined_call_operand.vmem [shape: f32[4,8,32], index: 0, kind: input, shape index: {}]   ;;  %s1576_s7 = inlined_call_operand.vmem [shape: f32[16,128], index: 7, kind: input, shape index: {}]   ;;  %s1577_s1 = inlined_call_operand.vmem [shape: f32[4,1,8], index: 1, kind: input, shape index: {}]   ;;  %s1578_s3 = inlined_call_operand.vmem [shape: bf16[32,32], index: 3, kind: input, shape index: {}]   ;;  %s1579_s4 = inlined_call_operand.vmem [shape: bf16[32,64], index: 4, kind: input, shape index: {}]   ;;  %s1580_s5 = inlined_call_operand.vmem [shape: bf16[64,32], index: 5, kind: input, shape index: {}]   ;;  %s1581_s6 = inlined_call_operand.vmem [shape: bf16[32,128], index: 6, kind: input, shape index: {}]   ;;  %s1582_s8 = inlined_call_operand.vmem [shape: f32[4,128], index: 8, kind: output, shape index: {}]  }
   0x1   :  { %v1247_v0 = vld [vmem:[%s1574_s2 + $0x8] sm:$0xff]   ;;  %v1248_v1 = vld [vmem:[%s1574_s2] sm:$0xff]   ;;  %v1357_v5 = vld [vmem:[%s1575_s0 + $0x10] sm:$0xff]  ;;  %1159 = vmatprep.subr.bf16.mxu1 %v1287_v12  ;;  %1161 = vmatprep.mubr.msk.bf16.mxu1 %vm1288_vm1, %v1287_v12  ;;  %vm342_vm2 = vcmask 64512   ;;  %vm396_vm3 = vcmask 1043456   ;;  %vm755_vm4 = vcmask 1041409  }
   0x2   :  { %1151 = vmatprep.subr.bf16.mxu0 %v1247_v0  ;;  %v1345_v2 = vld [vmem:[%s1575_s0] sm:$0xff]  ;;  %v1350_v3 = vld [vmem:[%s1575_s0 + $0x8] sm:$0xff]  ;;  %v1362_v6 = vld [vmem:[%s1575_s0 + $0x18] sm:$0xff]  ;;  %v1368_v9 = vshrl.u32 %v46_v8, 7  ;;  %s1289_s0 = smov 96   ;;  %vm758_vm5 = vcmask 1042434  }
   0x3   :  { %1152 = vmatpush3.bf16.msra.mxu0 %v1247_v0  ;;  %v40_v4 = vpack.c.bf16 %v1350_v3, %v1345_v2  ;;  %v41_v7 = vpack.c.bf16 %v1362_v6, %v1357_v5  ;;  %v1374_v11 = vld [vmem:[%s1576_s7] sm:$0xff]  ;;  %vm761_vm6 = vcmask 1043459   ;;  %vm865_vm7 = vcmask 523264  }
   0x4   :  { %1153 = vmatprep.subr.bf16.mxu0 %v1248_v1  ;;  %v48_v10 = vsub.s32 0, %v1368_v9  ;;  %v1089_v34 = vld [vmem:[%s1577_s1] ss:$0 sm:$0xff]  ;;  %v1090_v38 = vld [vmem:[%s1577_s1 + $0x1] ss:$0 sm:$0xff]  ;;  %vm932_vm8 = vcmask 257024  }
   0x5   :  { %1155 = vmatprep.mubr.msk.bf16.mxu0 %vm62_vm0, %v40_v4  ;;  %v1091_v45 = vld [vmem:[%s1577_s1 + $0x2] ss:$0 sm:$0xff]  ;;  %v1092_v52 = vld [vmem:[%s1577_s1 + $0x3] ss:$0 sm:$0xff] }
   0x6   :  { %v49_v13 = vrot.slane %v1374_v11, %v48_v10 }
   0x7   :  { %1154 = vmatpush3.bf16.msra.mxu0 %v1248_v1 }
   0x8   :  { %1165 = vmatprep.subr.bf16.mxu0 %v1287_v12 }
   0xa   :  { %1156 = vmatmul.mubr.msk.bf16.vlgmr.msra.gmra.mxu0 %vm62_vm0, %v41_v7 }
   0xb   :  { %1167 = vmatprep.mubr.msk.bf16.mxu0 %vm1288_vm1, %v1287_v12 }
  0xca   :  { %v1157_v14 = vpop.f32.mrf.mxu0 }
  0xcb   :  { %v112_v15 = vadd.f32 %v1157_v14, %v49_v13 }
  0xcc   :  { %v103_v16 = vpop.f32.mrf.mxu0 }
  0xcd   :  { %v1385_v17 = vpack.c.bf16 %v112_v15, %v112_v15  ;;  %v104_v18 = vadd.f32 %v103_v16, %v49_v13 }
  0xce   :  { %v1158_v19 = vpop.f32.mrf.mxu0 }
  0xcf   :  { %v1387_v20 = vpack.c.bf16 %v104_v18, %v104_v18  ;;  %v115_v21 = vadd.f32 %v1158_v19, %v49_v13  ;;  %245 = vrot.lane.b32.xlu1 %v1385_v17, %s1289_s0 }
  0xd0   :  { %v106_v22 = vpop.f32.mrf.mxu0 }
  0xd1   :  { %v1390_v23 = vpack.c.bf16 %v115_v21, %v115_v21  ;;  %v107_v24 = vadd.f32 %v106_v22, %v49_v13  ;;  %147 = vrot.lane.b32.xlu0 %v1387_v20, %s1289_s0 }
  0xd3   :  { %v1393_v25 = vpack.c.bf16 %v107_v24, %v107_v24  ;;  %294 = vrot.lane.b32.xlu1 %v1390_v23, %s1289_s0 }
  0xd5   :  { %196 = vrot.lane.b32.xlu0 %v1393_v25, %s1289_s0 }
 0x141   :  { %v246_v28 = vpop.permute.xlu1 %245 }
 0x142   :  { %v251_v31 = vsel %vm62_vm0, %v246_v28, 0 }
 0x143   :  { %v148_v26 = vpop.permute.xlu0 %147 }
 0x144   :  { %v153_v27 = vsel %vm62_vm0, %v148_v26, 0 }
 0x145   :  { %1160 = vmatpush3.bf16.xpose.msra.mxu1 %v153_v27  ;;  %v295_v32 = vpop.permute.xlu1 %294 }
 0x146   :  { %1171 = vmatprep.subr.bf16.mxu1 %v1287_v12  ;;  %v300_v33 = vsel %vm62_vm0, %v295_v32, 0 }
 0x147   :  { %v197_v29 = vpop.permute.xlu0 %196 }
 0x148   :  { %v202_v30 = vsel %vm62_vm0, %v197_v29, 0 }
 0x149   :  { %1166 = vmatpush3.bf16.xpose.msra.mxu0 %v202_v30 }
 0x14a   :  { %1177 = vmatprep.subr.bf16.mxu0 %v1287_v12 }
 0x14c   :  { %1162 = vmatmul.mubr.msk.bf16.vlgmr.msra.gmra.mxu1 %vm62_vm0, %v1387_v20 }
 0x14d   :  { %1172 = vmatpush3.bf16.xpose.msra.mxu1 %v251_v31  ;;  %1173 = vmatprep.mubr.msk.bf16.mxu1 %vm1288_vm1, %v1287_v12 }
 0x14e   :  { %1183 = vmatprep.subr.bf16.mxu1 %v1287_v12 }
 0x150   :  { %1168 = vmatmul.mubr.msk.bf16.vlgmr.msra.gmra.mxu0 %vm62_vm0, %v1393_v25 }
 0x151   :  { %1178 = vmatpush3.bf16.xpose.msra.mxu0 %v300_v33  ;;  %1179 = vmatprep.mubr.msk.bf16.mxu0 %vm1288_vm1, %v1287_v12 }
 0x152   :  { %1189 = vmatprep.subr.bf16.mxu0 %v1287_v12 }
 0x154   :  { %1174 = vmatmul.mubr.msk.bf16.vlgmr.msra.gmra.mxu1 %vm62_vm0, %v1385_v17 }
 0x155   :  { %1185 = vmatprep.mubr.msk.bf16.mxu1 %vm1288_vm1, %v1287_v12 }
 0x158   :  { %1180 = vmatmul.mubr.msk.bf16.vlgmr.msra.gmra.mxu0 %vm62_vm0, %v1390_v23 }
 0x159   :  { %1191 = vmatprep.mubr.msk.bf16.mxu0 %vm1288_vm1, %v1287_v12 }
 0x20c   :  { %v189_v35 = vpop.f32.mrf.mxu1 }
 0x20d   :  { %v190_v36 = vadd.f32 %v1089_v34, %v189_v35 }
 0x20e   :  { %v1163_v37 = vpop.f32.mrf.mxu1 }
 0x20f   :  { %v343_v39 = vsel %vm342_vm2, %v190_v36, -inf }
 0x210   :  { %344 = vmax.xlane.f32.xlu0 %v343_v39  ;;  %v192_v40 = vpop.f32.mrf.mxu1  ;;  %v238_v41 = vpop.f32.mrf.mxu0 }
 0x211   :  { %v239_v42 = vadd.f32 %v1090_v38, %v238_v41 }
 0x212   :  { %v1164_v43 = vpop.f32.mrf.mxu1  ;;  %v1169_v44 = vpop.f32.mrf.mxu0 }
 0x213   :  { %v346_v46 = vsel %vm342_vm2, %v239_v42, -inf }
 0x214   :  { %v287_v47 = vpop.f32.mrf.mxu1  ;;  %347 = vmax.xlane.f32.xlu1 %v346_v46  ;;  %v241_v48 = vpop.f32.mrf.mxu0 }
 0x215   :  { %v288_v49 = vadd.f32 %v1091_v45, %v287_v47 }
 0x216   :  { %v1170_v50 = vpop.f32.mrf.mxu0  ;;  %v1175_v51 = vpop.f32.mrf.mxu1 }
 0x217   :  { %v349_v53 = vsel %vm342_vm2, %v288_v49, -inf  ;;  %v1249_v50 = vld [vmem:[%s1578_s3 + $0x8] sm:$0xff]   ;;  %v1250_v51 = vld [vmem:[%s1578_s3] sm:$0xff]  }
 0x218   :  { %350 = vmax.xlane.f32.xlu0 %v349_v53  ;;  %v290_v54 = vpop.f32.mrf.mxu1  ;;  %v336_v55 = vpop.f32.mrf.mxu0 }
 0x219   :  { %v337_v56 = vadd.f32 %v1092_v52, %v336_v55 }
 0x21a   :  { %v1176_v57 = vpop.f32.mrf.mxu1  ;;  %v1181_v58 = vpop.f32.mrf.mxu0 }
 0x21b   :  { %v352_v59 = vsel %vm342_vm2, %v337_v56, -inf }
 0x21c   :  { %353 = vmax.xlane.f32.xlu0 %v352_v59  ;;  %v339_v60 = vpop.f32.mrf.mxu0 }
 0x21e   :  { %v1182_v61 = vpop.f32.mrf.mxu0 }
 0x225   :  { %391 = vrot.lane.b32.xlu1 %v1387_v20, %s1290_s26 }
 0x299   :  { %v345_v62 = vpop.xlane.xlu0 %344 }
 0x29a   :  { %v355_v63 = vsub.f32 %v190_v36, %v345_v62 }
 0x29c   :  { %v359_v0 = vmul.f32 1.442695, %v355_v63 }
 0x29d   :  { %v348_v1 = vpop.xlane.xlu1 %347 }
 0x29e   :  { %1259 = vpow2.f32 %v359_v0  ;;  %v356_v4 = vsub.f32 %v239_v42, %v348_v1 }
 0x2a0   :  { %v361_v7 = vmul.f32 1.442695, %v356_v4 }
 0x2a1   :  { %v392_v8 = vpop.permute.xlu1 %391  ;;  %v351_v13 = vpop.xlane.xlu0 %350 }
 0x2a2   :  { %1261 = vpow2.f32 %v361_v7  ;;  %v398_v14 = vsel %vm396_vm3, %v392_v8, 0  ;;  %v357_v15 = vsub.f32 %v288_v49, %v351_v13 }
 0x2a3   :  { %1184 = vmatpush3.bf16.msra.mxu1 %v398_v14  ;;  %v592_v14 = vsub.s32 1, %v1368_v9 }
 0x2a4   :  { %v363_v16 = vmul.f32 1.442695, %v357_v15  ;;  %1195 = vmatprep.subr.bf16.mxu1 %v1287_v12 }
 0x2a5   :  { %v354_v18 = vpop.xlane.xlu0 %353  ;;  %v593_v15 = vrot.slane %v1374_v11, %v592_v14 }
 0x2a6   :  { %1263 = vpow2.f32 %v363_v16  ;;  %v358_v19 = vsub.f32 %v337_v56, %v354_v18 }
 0x2a8   :  { %v365_v20 = vmul.f32 1.442695, %v358_v19 }
 0x2aa   :  { %1265 = vpow2.f32 %v365_v20 }
 0x2ab   :  { %v1260_v21 = vpop.eup %1259 }
 0x2ac   :  { %v367_v22 = vsel %vm342_vm2, %v1260_v21, 0.0 }
 0x2ad   :  { %368 = vadd.xlane.f32.xlu1 %v367_v22 }
 0x2af   :  { %v1262_v24 = vpop.eup %1261 }
 0x2b0   :  { %v370_v26 = vsel %vm342_vm2, %v1262_v24, 0.0 }
 0x2b1   :  { %371 = vadd.xlane.f32.xlu0 %v370_v26 }
 0x2b3   :  { %v1264_v27 = vpop.eup %1263 }
 0x2b4   :  { %v373_v28 = vsel %vm342_vm2, %v1264_v27, 0.0 }
 0x2b5   :  { %374 = vadd.xlane.f32.xlu1 %v373_v28 }
 0x2b7   :  { %v1266_v29 = vpop.eup %1265 }
 0x2b8   :  { %v376_v30 = vsel %vm342_vm2, %v1266_v29, 0.0 }
 0x2b9   :  { %377 = vadd.xlane.f32.xlu0 %v376_v30 }
 0x2c6   :  { %488 = vrot.lane.b32.xlu1 %v1385_v17, %s1290_s26 }
 0x2ca   :  { %536 = vrot.lane.b32.xlu1 %v1390_v23, %s1290_s26 }
 0x2cf   :  { %440 = vrot.lane.b32.xlu0 %v1393_v25, %s1290_s26 }
 0x336   :  { %v369_v31 = vpop.xlane.xlu1 %368 }
 0x337   :  { %1267 = vrcp.f32 %v369_v31 }
 0x33a   :  { %v372_v32 = vpop.xlane.xlu0 %371 }
 0x33b   :  { %1269 = vrcp.f32 %v372_v32 }
 0x33e   :  { %v375_v33 = vpop.xlane.xlu1 %374 }
 0x33f   :  { %1271 = vrcp.f32 %v375_v33 }
 0x342   :  { %v378_v34 = vpop.xlane.xlu0 %377  ;;  %v489_v36 = vpop.permute.xlu1 %488 }
 0x343   :  { %1273 = vrcp.f32 %v378_v34  ;;  %v494_v23 = vsel %vm396_vm3, %v489_v36, 0 }
 0x344   :  { %v1268_v35 = vpop.eup %1267 }
 0x345   :  { %v383_v37 = vmul.f32 %v1268_v35, %v1260_v21 }
 0x346   :  { %v441_v38 = vpop.permute.xlu0 %440  ;;  %v537_v41 = vpop.permute.xlu1 %536 }
 0x347   :  { %v446_v17 = vsel %vm396_vm3, %v441_v38, 0  ;;  %v387_v39 = vpack.c.bf16 %v383_v37, %v383_v37  ;;  %v542_v44 = vsel %vm396_vm3, %v537_v41, 0 }
 0x348   :  { %v1270_v40 = vpop.eup %1269  ;;  %1190 = vmatpush3.bf16.msra.mxu0 %v446_v17 }
 0x349   :  { %1186 = vmatmul.mubr.msk.bf16.vlgmr.msra.gmra.mxu1 %vm342_vm2, %v387_v39  ;;  %1201 = vmatprep.subr.bf16.mxu0 %v1287_v12  ;;  %v384_v25 = vmul.f32 %v1270_v40, %v1262_v24 }
 0x34a   :  { %1196 = vmatpush3.bf16.msra.mxu1 %v494_v23  ;;  %1197 = vmatprep.mubr.msk.bf16.mxu1 %vm1288_vm1, %v1287_v12 }
 0x34b   :  { %v388_v42 = vpack.c.bf16 %v384_v25, %v384_v25  ;;  %1207 = vmatprep.subr.bf16.mxu1 %v1249_v50 }
 0x34c   :  { %v1272_v43 = vpop.eup %1271 }
 0x34d   :  { %1192 = vmatmul.mubr.msk.bf16.vlgmr.msra.gmra.mxu0 %vm342_vm2, %v388_v42  ;;  %v385_v45 = vmul.f32 %v1272_v43, %v1264_v27 }
 0x34e   :  { %1202 = vmatpush3.bf16.msra.mxu0 %v542_v44  ;;  %1203 = vmatprep.mubr.msk.bf16.mxu0 %vm1288_vm1, %v1287_v12 }
 0x34f   :  { %v389_v46 = vpack.c.bf16 %v385_v45, %v385_v45  ;;  %1215 = vmatprep.subr.bf16.mxu0 %v1287_v12 }
 0x350   :  { %v1274_v47 = vpop.eup %1273 }
 0x351   :  { %1198 = vmatmul.mubr.msk.bf16.vlgmr.msra.gmra.mxu1 %vm342_vm2, %v389_v46  ;;  %v386_v48 = vmul.f32 %v1274_v47, %v1266_v29 }
 0x352   :  { %1208 = vmatpush3.bf16.msra.mxu1 %v1249_v50 }
 0x353   :  { %v390_v49 = vpack.c.bf16 %v386_v48, %v386_v48  ;;  %1209 = vmatprep.subr.bf16.mxu1 %v1250_v51  ;;  %v1251_v48 = vld [vmem:[%s1579_s4 + $0x8] sm:$0xff]  }
 0x355   :  { %1204 = vmatmul.mubr.msk.bf16.vlgmr.msra.gmra.mxu0 %vm342_vm2, %v390_v49  ;;  %v1252_v49 = vld [vmem:[%s1579_s4] sm:$0xff]  }
 0x356   :  { %1219 = vmatprep.mubr.msk.bf16.mxu0 %vm1288_vm1, %v1287_v12  ;;  %1210 = vmatpush3.bf16.msra.mxu1 %v1250_v51 }
 0x357   :  { %1223 = vmatprep.subr.bf16.mxu1 %v1287_v12  ;;  %1216 = vmatpush3.bf16.msra.mxu0 %v1251_v48 }
 0x358   :  { %1217 = vmatprep.subr.bf16.mxu0 %v1287_v12 }
 0x35b   :  { %1218 = vmatpush3.bf16.msra.mxu0 %v1252_v49 }
 0x35c   :  { %1235 = vmatprep.subr.bf16.mxu0 %v1287_v12 }
 0x409   :  { %v434_v52 = vpop.f32.mrf.mxu1 }
 0x40b   :  { %v1187_v53 = vpop.f32.mrf.mxu1 }
 0x40d   :  { %v437_v54 = vpop.f32.mrf.mxu1  ;;  %v482_v55 = vpop.f32.mrf.mxu0 }
 0x40e   :  { %v584_v56 = vpack.c.bf16 %v482_v55, %v434_v52 }
 0x40f   :  { %v1188_v57 = vpop.f32.mrf.mxu1  ;;  %v1193_v58 = vpop.f32.mrf.mxu0 }
 0x410   :  { %1211 = vmatprep.mubr.msk.bf16.mxu1 %vm62_vm0, %v584_v56 }
 0x411   :  { %v485_v59 = vpop.f32.mrf.mxu0  ;;  %v530_v60 = vpop.f32.mrf.mxu1 }
 0x413   :  { %v1194_v61 = vpop.f32.mrf.mxu0  ;;  %v1199_v62 = vpop.f32.mrf.mxu1 }
 0x414   :  { %v720_v62 = vsub.s32 2, %v1368_v9 }
 0x415   :  { %v533_v63 = vpop.f32.mrf.mxu1  ;;  %v578_v0 = vpop.f32.mrf.mxu0 }
 0x416   :  { %v585_v1 = vpack.c.bf16 %v578_v0, %v530_v60  ;;  %v721_v0 = vrot.slane %v1374_v11, %v720_v62 }
 0x417   :  { %v1200_v4 = vpop.f32.mrf.mxu1  ;;  %v1205_v7 = vpop.f32.mrf.mxu0 }
 0x418   :  { %1212 = vmatmul.mubr.msk.bf16.vlgmr.msra.gmra.mxu1 %vm62_vm0, %v585_v1  ;;  %v728_v1 = vsub.s32 3, %v1368_v9 }
 0x419   :  { %v581_v8 = vpop.f32.mrf.mxu0  ;;  %1231 = vmatprep.mubr.msk.bf16.mxu1 %vm1288_vm1, %v1287_v12 }
 0x41a   :  { %v729_v7 = vrot.slane %v1374_v11, %v728_v1 }
 0x41b   :  { %v1206_v13 = vpop.f32.mrf.mxu0 }
 0x4d8   :  { %v1213_v16 = vpop.f32.mrf.mxu1 }
 0x4d9   :  { %v655_v18 = vadd.f32 %v1213_v16, %v593_v15 }
 0x4da   :  { %v646_v19 = vpop.f32.mrf.mxu1 }
 0x4db   :  { %v647_v20 = vadd.f32 %v646_v19, %v593_v15  ;;  %v663_v21 = vadd.f32 %v655_v18, %v1357_v5 }
 0x4dc   :  { %v1214_v22 = vpop.f32.mrf.mxu1 }
 0x4dd   :  { %v671_v24 = vsel %vm62_vm0, %v663_v21, 0.0  ;;  %v661_v26 = vadd.f32 %v647_v20, %v1345_v2  ;;  %v658_v28 = vadd.f32 %v1214_v22, %v593_v15 }
 0x4de   :  { %672 = vadd.xlane.f32.xlu1 %v671_v24  ;;  %v649_v27 = vpop.f32.mrf.mxu1 }
 0x4df   :  { %v650_v29 = vadd.f32 %v649_v27, %v593_v15  ;;  %v665_v30 = vsel %vm62_vm0, %v661_v26, 0.0  ;;  %v664_v33 = vadd.f32 %v658_v28, %v1362_v6 }
 0x4e0   :  { %666 = vadd.xlane.f32.xlu0 %v665_v30 }
 0x4e1   :  { %v662_v31 = vadd.f32 %v650_v29, %v1350_v3  ;;  %v674_v5 = vsel %vm62_vm0, %v664_v33, 0.0 }
 0x4e3   :  { %v668_v32 = vsel %vm62_vm0, %v662_v31, 0.0 }
 0x4e4   :  { %669 = vadd.xlane.f32.xlu0 %v668_v32 }
 0x4e8   :  { %675 = vadd.xlane.f32.xlu0 %v674_v5 }
 0x567   :  { %v673_v34 = vpop.xlane.xlu1 %672 }
 0x568   :  { %v680_v35 = vmul.f32 0.03125, %v673_v34 }
 0x569   :  { %v667_v2 = vpop.xlane.xlu0 %666 }
 0x56a   :  { %v684_v36 = vsub.f32 %v663_v21, %v680_v35  ;;  %v678_v37 = vmul.f32 0.03125, %v667_v2 }
 0x56c   :  { %v688_v38 = vmul.f32 %v684_v36, %v684_v36  ;;  %v682_v3 = vsub.f32 %v661_v26, %v678_v37 }
 0x56d   :  { %v670_v17 = vpop.xlane.xlu0 %669 }
 0x56e   :  { %v679_v39 = vmul.f32 0.03125, %v670_v17  ;;  %v696_v40 = vsel %vm62_vm0, %v688_v38, 0.0  ;;  %v686_v44 = vmul.f32 %v682_v3, %v682_v3 }
 0x56f   :  { %697 = vadd.xlane.f32.xlu0 %v696_v40 }
 0x570   :  { %v683_v23 = vsub.f32 %v662_v31, %v679_v39  ;;  %v690_v46 = vsel %vm62_vm0, %v686_v44, 0.0 }
 0x571   :  { %v676_v25 = vpop.xlane.xlu0 %675 }
 0x572   :  { %v681_v41 = vmul.f32 0.03125, %v676_v25  ;;  %v687_v6 = vmul.f32 %v683_v23, %v683_v23  ;;  %v1255_v25 = vld [vmem:[%s1580_s5 + $0x8] sm:$0xff]  }
 0x574   :  { %v685_v42 = vsub.f32 %v664_v33, %v681_v41  ;;  %v693_v43 = vsel %vm62_vm0, %v687_v6, 0.0  ;;  %v1256_v41 = vld [vmem:[%s1580_s5] sm:$0xff]   ;;  %v744_v6 = vsub.s32 4, %v1368_v9 }
 0x575   :  { %694 = vadd.xlane.f32.xlu1 %v693_v43 }
 0x576   :  { %v689_v45 = vmul.f32 %v685_v42, %v685_v42 }
 0x578   :  { %v699_v47 = vsel %vm62_vm0, %v689_v45, 0.0 }
 0x579   :  { %691 = vadd.xlane.f32.xlu1 %v690_v46  ;;  %700 = vadd.xlane.f32.xlu0 %v699_v47 }
 0x5f8   :  { %v698_v50 = vpop.xlane.xlu0 %697 }
 0x5f9   :  { %v704_v51 = vmul.f32 0.03125, %v698_v50 }
 0x5fb   :  { %v708_v52 = vadd.f32 1e-07, %v704_v51 }
 0x5fd   :  { %1275 = vrsqrt.f32 %v708_v52 }
 0x5fe   :  { %v695_v53 = vpop.xlane.xlu1 %694 }
 0x5ff   :  { %v703_v54 = vmul.f32 0.03125, %v695_v53 }
 0x601   :  { %v707_v55 = vadd.f32 1e-07, %v703_v54 }
 0x602   :  { %v692_v56 = vpop.xlane.xlu1 %691  ;;  %v701_v57 = vpop.xlane.xlu0 %700 }
 0x603   :  { %1277 = vrsqrt.f32 %v707_v55  ;;  %v702_v58 = vmul.f32 0.03125, %v692_v56  ;;  %v705_v59 = vmul.f32 0.03125, %v701_v57 }
 0x605   :  { %v706_v60 = vadd.f32 1e-07, %v702_v58  ;;  %v709_v61 = vadd.f32 1e-07, %v705_v59  ;;  %v839_v58 = vsub.s32 5, %v1368_v9 }
 0x607   :  { %1279 = vrsqrt.f32 %v706_v60  ;;  %v840_v59 = vrot.slane %v1374_v11, %v839_v58 }
 0x608   :  { %1281 = vrsqrt.f32 %v709_v61 }
 0x60a   :  { %v1276_v63 = vpop.eup %1275 }
 0x60b   :  { %v716_v4 = vmul.f32 %v1276_v63, %v684_v36 }
 0x60d   :  { %v724_v8 = vmul.f32 %v721_v0, %v716_v4 }
 0x60f   :  { %v1503_v15 = vadd.f32 %v729_v7, %v724_v8 }
 0x610   :  { %v1278_v13 = vpop.eup %1277 }
 0x611   :  { %v715_v14 = vmul.f32 %v1278_v13, %v683_v23  ;;  %v736_v24 = vpack.c.bf16 %v1503_v15, %v1503_v15  ;;  %v1254_v23 = vld [vmem:[%s1580_s5 + $0x10] sm:$0xff]  }
 0x613   :  { %v723_v16 = vmul.f32 %v721_v0, %v715_v14  ;;  %v752_v32 = vunpack.c.l.b16 %v736_v24 }
 0x614   :  { %v1280_v18 = vpop.eup %1279 }
 0x615   :  { %v1282_v19 = vpop.eup %1281  ;;  %v1505_v20 = vadd.f32 %v729_v7, %v723_v16  ;;  %v714_v21 = vmul.f32 %v1280_v18, %v682_v3  ;;  %v757_v36 = vrot.slane %v752_v32, 6  ;;  %v1253_v3 = vld [vmem:[%s1580_s5 + $0x18] sm:$0xff]  }
 0x616   :  { %v717_v22 = vmul.f32 %v1282_v19, %v685_v42  ;;  %1224 = vmatpush3.bf16.msra.mxu1 %v1253_v3  ;;  %v745_v42 = vrot.slane %v1374_v11, %v744_v6 }
 0x617   :  { %v735_v26 = vpack.c.bf16 %v1505_v20, %v1505_v20  ;;  %v722_v27 = vmul.f32 %v721_v0, %v714_v21  ;;  %1225 = vmatprep.subr.bf16.mxu1 %v1287_v12 }
 0x618   :  { %v725_v28 = vmul.f32 %v721_v0, %v717_v22 }
 0x619   :  { %v1511_v29 = vadd.f32 %v729_v7, %v722_v27  ;;  %v751_v30 = vunpack.c.l.b16 %v735_v26 }
 0x61a   :  { %v733_v31 = vadd.f32 %v729_v7, %v725_v28  ;;  %1226 = vmatpush3.bf16.msra.mxu1 %v1254_v23 }
 0x61b   :  { %v734_v33 = vpack.c.bf16 %v1511_v29, %v1511_v29  ;;  %v754_v35 = vrot.slane %v751_v30, 7  ;;  %1227 = vmatprep.subr.bf16.mxu1 %v1287_v12 }
 0x61c   :  { %v737_v5 = vpack.c.bf16 %v733_v31, %v733_v31 }
 0x61d   :  { %v750_v34 = vunpack.c.l.b16 %v734_v33 }
 0x61e   :  { %v753_v2 = vunpack.c.l.b16 %v737_v5  ;;  %1228 = vmatpush3.bf16.msra.mxu1 %v1255_v25  ;;  %v1257_v25 = vld [vmem:[%s1581_s6 + $0x8] sm:$0xff]  }
 0x61f   :  { %v756_v37 = vsel %vm755_vm4, %v754_v35, %v750_v34  ;;  %1229 = vmatprep.subr.bf16.mxu1 %v1287_v12 }
 0x620   :  { %v759_v38 = vsel %vm758_vm5, %v757_v36, %v756_v37  ;;  %v760_v17 = vrot.slane %v753_v2, 5 }
 0x622   :  { %v762_v39 = vsel %vm761_vm6, %v760_v17, %v759_v38  ;;  %1230 = vmatpush3.bf16.msra.mxu1 %v1256_v41  ;;  %v1258_v41 = vld [vmem:[%s1581_s6] sm:$0xff]  }
 0x623   :  { %v763_v40 = vpack.c.b16 %v762_v39, %v762_v39 }
 0x625   :  { %1220 = vmatmul.mubr.msk.bf16.vlgmr.msra.gmra.mxu0 %vm62_vm0, %v763_v40 }
 0x626   :  { %1239 = vmatprep.mubr.msk.bf16.mxu0 %vm1288_vm1, %v1287_v12  ;;  %1236 = vmatpush3.bf16.msra.mxu0 %v1257_v25 }
 0x627   :  { %1237 = vmatprep.subr.bf16.mxu0 %v1287_v12 }
 0x62a   :  { %1238 = vmatpush3.bf16.msra.mxu0 %v1258_v41 }
 0x6e5   :  { %v813_v43 = vpop.f32.mrf.mxu0 }
 0x6e6   :  { %v814_v44 = vadd.f32 %v813_v43, %v745_v42 }
 0x6e7   :  { %v1221_v45 = vpop.f32.mrf.mxu0 }
 0x6e8   :  { %v819_v46 = vmul.f32 %v814_v44, %v814_v44  ;;  %v992_v45 = vsub.s32 7, %v1368_v9 }
 0x6e9   :  { %v816_v47 = vpop.f32.mrf.mxu0 }
 0x6ea   :  { %v820_v48 = vmul.f32 %v819_v46, %v814_v44 }
 0x6eb   :  { %v1222_v49 = vpop.f32.mrf.mxu0 }
 0x6ec   :  { %v821_v50 = vmul.f32 0.044715, %v820_v48  ;;  %v993_v48 = vrot.slane %v1374_v11, %v992_v45 }
 0x6ee   :  { %v822_v51 = vadd.f32 %v821_v50, %v814_v44 }
 0x6f0   :  { %v823_v52 = vmul.f32 0.7978846, %v822_v51 }
 0x6f2   :  { %1283 = vtanh.f32 %v823_v52 }
 0x6ff   :  { %v1284_v53 = vpop.eup %1283 }
 0x700   :  { %v825_v54 = vadd.f32 1.0, %v1284_v53 }
 0x702   :  { %v826_v55 = vmul.f32 0.5, %v825_v54 }
 0x704   :  { %v827_v56 = vmul.f32 %v826_v55, %v814_v44  ;;  %v984_v44 = vsub.s32 6, %v1368_v9 }
 0x706   :  { %v828_v57 = vpack.c.bf16 %v827_v56, %v827_v56  ;;  %v985_v46 = vrot.slane %v1374_v11, %v984_v44 }
 0x708   :  { %1232 = vmatmul.mubr.msk.bf16.vlgmr.msra.gmra.mxu1 %vm865_vm7, %v828_v57 }
 0x7c8   :  { %v903_v60 = vpop.f32.mrf.mxu1 }
 0x7c9   :  { %v904_v61 = vadd.f32 %v903_v60, %v840_v59 }
 0x7ca   :  { %v1233_v62 = vpop.f32.mrf.mxu1 }
 0x7cb   :  { %v910_v63 = vrot.slane %v904_v61, 1  ;;  %v911_v0 = vrot.slane %v904_v61, 2  ;;  %v912_v1 = vrot.slane %v904_v61, 3  ;;  %v917_v16 = vadd.f32 %v904_v61, %v1511_v29 }
 0x7cc   :  { %v906_v4 = vpop.f32.mrf.mxu1 }
 0x7cd   :  { %v918_v7 = vadd.f32 %v910_v63, %v1505_v20  ;;  %v919_v8 = vadd.f32 %v911_v0, %v1503_v15  ;;  %v920_v13 = vadd.f32 %v912_v1, %v733_v31 }
 0x7ce   :  { %v1234_v14 = vpop.f32.mrf.mxu1 }
 0x7cf   :  { %v925_v18 = vrot.slane %v918_v7, 7  ;;  %v927_v19 = vrot.slane %v919_v8, 6  ;;  %v929_v22 = vrot.slane %v920_v13, 5 }
 0x7d1   :  { %v926_v21 = vsel %vm755_vm4, %v925_v18, %v917_v16 }
 0x7d2   :  { %v928_v24 = vsel %vm758_vm5, %v927_v19, %v926_v21 }
 0x7d3   :  { %v930_v26 = vsel %vm761_vm6, %v929_v22, %v928_v24 }
 0x7d4   :  { %v933_v27 = vsel %vm932_vm8, %v930_v26, 0.0  ;;  %v39_v26 = vld [vmem:[%s1576_s7 + $0x8] sm:$0xff] }
 0x7d5   :  { %934 = vadd.xlane.f32.xlu1 %v933_v27  ;;  %v1009_v27 = vrot.slane %v39_v26, %v48_v10 }
 0x85e   :  { %v935_v20 = vpop.xlane.xlu1 %934 }
 0x85f   :  { %v936_v28 = vmul.f32 0.03125, %v935_v20 }
 0x861   :  { %v938_v15 = vrot.slane %v936_v28, 1  ;;  %v939_v30 = vrot.slane %v936_v28, 2  ;;  %v940_v31 = vrot.slane %v936_v28, 3  ;;  %v945_v32 = vsub.f32 %v917_v16, %v936_v28 }
 0x863   :  { %v946_v29 = vsub.f32 %v918_v7, %v938_v15  ;;  %v947_v33 = vsub.f32 %v919_v8, %v939_v30  ;;  %v948_v5 = vsub.f32 %v920_v13, %v940_v31  ;;  %v949_v36 = vmul.f32 %v945_v32, %v945_v32 }
 0x865   :  { %v950_v34 = vmul.f32 %v946_v29, %v946_v29  ;;  %v951_v35 = vmul.f32 %v947_v33, %v947_v33  ;;  %v952_v2 = vmul.f32 %v948_v5, %v948_v5 }
 0x867   :  { %v957_v37 = vrot.slane %v950_v34, 7  ;;  %v959_v38 = vrot.slane %v951_v35, 6  ;;  %v961_v39 = vrot.slane %v952_v2, 5 }
 0x869   :  { %v958_v17 = vsel %vm755_vm4, %v957_v37, %v949_v36 }
 0x86a   :  { %v960_v40 = vsel %vm758_vm5, %v959_v38, %v958_v17 }
 0x86b   :  { %v962_v3 = vsel %vm761_vm6, %v961_v39, %v960_v40 }
 0x86c   :  { %v964_v23 = vsel %vm932_vm8, %v962_v3, 0.0 }
 0x86d   :  { %965 = vadd.xlane.f32.xlu0 %v964_v23 }
 0x8f6   :  { %v966_v6 = vpop.xlane.xlu0 %965 }
 0x8f7   :  { %v967_v42 = vmul.f32 0.03125, %v966_v6 }
 0x8f9   :  { %v968_v43 = vadd.f32 1e-07, %v967_v42 }
 0x8fb   :  { %1285 = vrsqrt.f32 %v968_v43 }
 0x908   :  { %v1286_v47 = vpop.eup %1285 }
 0x909   :  { %v971_v49 = vrot.slane %v1286_v47, 1  ;;  %v972_v50 = vrot.slane %v1286_v47, 2  ;;  %v973_v51 = vrot.slane %v1286_v47, 3  ;;  %v978_v52 = vmul.f32 %v1286_v47, %v945_v32 }
 0x90b   :  { %v979_v53 = vmul.f32 %v971_v49, %v946_v29  ;;  %v980_v12 = vmul.f32 %v972_v50, %v947_v33  ;;  %v981_v54 = vmul.f32 %v973_v51, %v948_v5  ;;  %v986_v55 = vmul.f32 %v985_v46, %v978_v52 }
 0x90d   :  { %v987_v56 = vmul.f32 %v985_v46, %v979_v53  ;;  %v988_v57 = vmul.f32 %v985_v46, %v980_v12  ;;  %v989_v58 = vmul.f32 %v985_v46, %v981_v54  ;;  %v994_v59 = vadd.f32 %v993_v48, %v986_v55 }
 0x90f   :  { %v995_v60 = vadd.f32 %v993_v48, %v987_v56  ;;  %v996_v61 = vadd.f32 %v993_v48, %v988_v57  ;;  %v997_v62 = vadd.f32 %v993_v48, %v989_v58  ;;  %v998_v63 = vpack.c.bf16 %v994_v59, %v994_v59 }
 0x911   :  { %v999_v0 = vpack.c.bf16 %v995_v60, %v995_v60  ;;  %v1000_v1 = vpack.c.bf16 %v996_v61, %v996_v61  ;;  %v1001_v4 = vpack.c.bf16 %v997_v62, %v997_v62  ;;  %v1014_v13 = vunpack.c.l.b16 %v998_v63 }
 0x913   :  { %v1015_v11 = vunpack.c.l.b16 %v999_v0  ;;  %v1016_v7 = vunpack.c.l.b16 %v1000_v1  ;;  %v1017_v8 = vunpack.c.l.b16 %v1001_v4 }
 0x915   :  { %v1018_v14 = vrot.slane %v1015_v11, 7  ;;  %v1020_v16 = vrot.slane %v1016_v7, 6  ;;  %v1022_v19 = vrot.slane %v1017_v8, 5 }
 0x917   :  { %v1019_v18 = vsel %vm755_vm4, %v1018_v14, %v1014_v13 }
 0x918   :  { %v1021_v21 = vsel %vm758_vm5, %v1020_v16, %v1019_v18 }
 0x919   :  { %v1023_v22 = vsel %vm761_vm6, %v1022_v19, %v1021_v21 }
 0x91a   :  { %v1024_v24 = vpack.c.b16 %v1023_v22, %v1023_v22 }
 0x91c   :  { %1240 = vmatmul.mubr.msk.bf16.vlgmr.msra.gmra.mxu0 %vm62_vm0, %v1024_v24 }
 0x9dc   :  { %v1074_v20 = vpop.f32.mrf.mxu0 }
 0x9dd   :  { %v1075_v28 = vadd.f32 %v1074_v20, %v1009_v27 }
 0x9de   :  { %v1241_v15 = vpop.f32.mrf.mxu0 }
 0x9df   :  { %1080 = vst [vmem:[%s1582_s8] sm:$0xf] %v1075_v28 }
 0x9e0   :  { %v1077_v30 = vpop.f32.mrf.mxu0 }
 0x9e2   :  { %v1242_v31 = vpop.f32.mrf.mxu0 }

</bundles_post_ra>
